<compile_context>
chip_gen: v6e
topology: v6e:2x2x1
jax: 0.10.0
libtpu: 0.0.40
codegen_flags: <defaults>
</compile_context>

<pallas_src>
import functools
import math

import jax
import jax.numpy as jnp
from jax.experimental import pallas as pl
from jax.experimental.pallas import tpu as pltpu

LANE = 128            # lane width (last-dim tiling quantum)
SUBLANE_F32 = 8       # f32 sublane quantum
SUBLANE_BF16 = 16     # bf16 packs 16 rows per sublane group
MAX_TM = 256          # one tile fills the v6e/v7x 256-wide MXU M dimension


def _round_up(n, m):
    return ((n + m - 1) // m) * m


def _choose_batch_tiling(batch):
    """Pick (tile_rows, padded_batch).

    tile_rows is a multiple of 16 (bf16 packing) capped at 256.  Batches that
    fit in <= 2 fat tiles are split into exactly two grid steps so v7x's two
    TensorCores both get work; larger batches use 256-row tiles.
    """
    b16 = _round_up(batch, SUBLANE_BF16)
    if b16 <= SUBLANE_BF16:
        tm = b16
    elif b16 <= 2 * MAX_TM:
        tm = _round_up((b16 + 1) // 2, SUBLANE_BF16)     # exactly two steps
    else:
        tm = MAX_TM
    b_pad = _round_up(b16, tm)
    return tm, b_pad


def _padded_tile_bytes(shape, dtype):
    d = jnp.dtype(dtype)
    sub = SUBLANE_BF16 if d.itemsize == 2 else SUBLANE_F32
    rows = _round_up(shape[0], sub) if len(shape) > 1 else 1
    cols = _round_up(shape[-1], LANE)
    return rows * cols * d.itemsize


def _vmem_budget_bytes(tm, d_in, d_out_pad, params, weight_buffers):
    """Resident VMEM footprint: pipelined x/out tiles + weight/bias buffers."""
    budget = 2 * _padded_tile_bytes((tm, d_in), jnp.bfloat16)        # x tile (double-buffered)
    budget += 2 * _padded_tile_bytes((tm, d_out_pad), jnp.float32)   # out tile (double-buffered)
    for (w, b) in params:
        budget += weight_buffers * _padded_tile_bytes(w.shape, w.dtype)
        budget += weight_buffers * _padded_tile_bytes(b.shape, b.dtype)
    return budget


# ----------------- capability probe: single-buffered resident weights -------- #
_SINGLE_BUFFER_OK = None


def _copy_kernel(x_ref, o_ref):
    o_ref[...] = x_ref[...]


def _single_buffer_weights_supported():
    """Probe once whether pipeline_mode=pl.Buffered(1) lowers/compiles on this runtime."""
    global _SINGLE_BUFFER_OK
    if _SINGLE_BUFFER_OK is not None:
        return _SINGLE_BUFFER_OK
    try:
        spec = pl.BlockSpec((8, 128), lambda i: (0, 0), pipeline_mode=pl.Buffered(1))
        f = pl.pallas_call(
            _copy_kernel,
            out_shape=jax.ShapeDtypeStruct((8, 128), jnp.float32),
            grid_spec=pltpu.PrefetchScalarGridSpec(
                num_scalar_prefetch=0,
                grid=(2,),
                in_specs=[spec],
                out_specs=pl.BlockSpec((8, 128), lambda i: (0, 0)),
            ),
        )
        jax.block_until_ready(f(jnp.zeros((8, 128), jnp.float32)))
        _SINGLE_BUFFER_OK = True
    except Exception:
        _SINGLE_BUFFER_OK = False
    return _SINGLE_BUFFER_OK


def _weight_spec(shape, single_buffer):
    # Constant index map -> block stays VMEM-resident across the whole grid.
    if single_buffer:
        return pl.BlockSpec(shape, lambda i: (0, 0), pipeline_mode=pl.Buffered(1))
    return pl.BlockSpec(shape, lambda i: (0, 0))


# ----------------------------- Pallas kernel -------------------------------- #
def _fused_pipeline_kernel(*refs, relu_flags):
    """Whole pipeline (all stages) fused into one kernel invocation.

    refs = (x_ref, w0_ref, b0_ref, w1_ref, b1_ref, ..., o_ref)

    x_ref : [TM, D0]            bf16 activations for this batch tile (D0 unpadded)
    wS_ref: [DS(_pad), DS1_pad] bf16 weights, VMEM-resident across the grid
    bS_ref: [1, DS1_pad]        f32 bias
    o_ref : [TM, Dlast_pad]     f32, lane-dense (last dim multiple of 128)
    """
    n_stages = len(relu_flags)
    x_ref = refs[0]
    o_ref = refs[1 + 2 * n_stages]

    h = x_ref[...]                                   # bf16 activations
    for s in range(n_stages):
        w_ref = refs[1 + 2 * s]
        b_ref = refs[2 + 2 * s]
        acc = jnp.dot(h, w_ref[...], preferred_element_type=jnp.float32)
        acc = acc + b_ref[...]                       # f32 epilogue, bias broadcast
        if relu_flags[s]:
            acc = jnp.maximum(acc, 0.0)
        # Feed the next MXU stage in bf16; keep the final result in f32.
        h = acc.astype(jnp.bfloat16) if s < n_stages - 1 else acc
        # TODO(synk): for very long batch loops, explicit weight staging via
        # pltpu.matmul_push_rhs/acc_lhs/pop could keep each RHS staged in the MXU.

    o_ref[...] = h.astype(o_ref.dtype)


# ------------------------------ Fused forward -------------------------------- #
@functools.partial(
    jax.jit, static_argnames=("relu_flags", "out_features", "single_buffer_weights"))
def pipeline_forward(x, params, *, relu_flags, out_features, single_buffer_weights=False):
    """Full pipeline: (optional batch pad) -> one fused pallas_call -> slice.

    x      : [B, in_features] f32
    params : tuple of (w bf16 [Din(_pad), Dout_pad], b f32 [1, Dout_pad])
    """
    n_stages = len(relu_flags)
    assert len(params) == n_stages
    B, d_in = x.shape
    assert params[0][0].shape[0] == d_in
    d_out_pad = params[-1][0].shape[1]

    tm, b_pad = _choose_batch_tiling(B)

    # bf16 MXU operands; the feature dim of x is NOT padded (the block spans the
    # full extent), so there is no wrapper-side pad kernel / extra HBM round trip.
    # Only the batch dim is zero-padded, and only when B isn't a tile multiple.
    x_b = x.astype(jnp.bfloat16)
    if b_pad != B:
        x_b = jnp.zeros((b_pad, d_in), jnp.bfloat16).at[:B].set(x_b)

    flat_params = []
    in_specs = [pl.BlockSpec((tm, d_in), lambda i: (i, 0))]
    for (w, b) in params:
        flat_params += [w, b]
        in_specs.append(_weight_spec(w.shape, single_buffer_weights))
        in_specs.append(_weight_spec(b.shape, single_buffer_weights))

    # Explicit VMEM budget; only set vmem_limit_bytes when the footprint would
    # actually outgrow the smallest default scoped limit (16 MiB on v5e;
    # 32 MiB on v6e/v7x — and v7x only has 64 MiB physical).
    weight_buffers = 1 if single_buffer_weights else 2
    budget = _vmem_budget_bytes(tm, d_in, d_out_pad, params, weight_buffers)
    need = 2 * budget + (1 << 20)        # 2x headroom for spills / internal scratch
    cp_kwargs = dict(dimension_semantics=("parallel",))   # batch tiles independent -> 2 TCs on v7x
    if need > 16 * 1024 * 1024:
        cp_kwargs["vmem_limit_bytes"] = int(need)

    # TODO(synk): for non-toy layer sizes this full-feature-width, all-weights-
    # resident fusion should be replaced by a K/N-tiled accumulator grid (P1+P3).
    out_p = pl.pallas_call(
        functools.partial(_fused_pipeline_kernel, relu_flags=relu_flags),
        out_shape=jax.ShapeDtypeStruct((b_pad, d_out_pad), jnp.float32),
        grid_spec=pltpu.PrefetchScalarGridSpec(
            num_scalar_prefetch=0,
            grid=(b_pad // tm,),
            in_specs=in_specs,
            out_specs=pl.BlockSpec((tm, d_out_pad), lambda i: (i, 0)),
        ),
        compiler_params=pltpu.CompilerParams(**cp_kwargs),
    )(x_b, *flat_params)

    # Strip batch/feature padding (the kernel's own store stays lane-dense).
    # NOTE(v5e option): a bf16 output would halve vst/HBM writeback if callers allow it.
    return out_p[:B, :out_features]


# --------------------------- Parameter construction -------------------------- #
def make_linear_params(key, in_features, out_features, dtype=jnp.float32):
    """Deterministic init mimicking torch.nn.Linear (uniform +/- 1/sqrt(fan_in)).

    Returns W with shape [in_features, out_features] (transposed vs. PyTorch)."""
    k_w, k_b = jax.random.split(key)
    bound = 1.0 / math.sqrt(in_features)
    w = jax.random.uniform(
        k_w, (in_features, out_features), dtype=dtype, minval=-bound, maxval=bound)
    b = jax.random.uniform(
        k_b, (out_features,), dtype=dtype, minval=-bound, maxval=bound)
    return w, b


class WeightParallelizedModelJAX:
    """Single-process emulation of Weight_Parallelized_Model's full pipeline.

    layer_list semantics: one (fused) layer per pipeline stage; forward is the
    sequential composition layer_{n-1}(... layer_0(x)).  All stages run inside
    ONE fused Pallas TPU kernel with inter-stage activations kept in VMEM.
    """

    def __init__(self, stage_dims, key):
        # stage_dims: list of (in_features, out_features, apply_relu)
        for s in range(1, len(stage_dims)):
            assert stage_dims[s][0] == stage_dims[s - 1][1], "stage dims must chain"
        self.stage_dims = stage_dims
        self.out_features = stage_dims[-1][1]
        self.relu_flags = tuple(bool(r) for (_, _, r) in stage_dims)

        keys = jax.random.split(key, len(stage_dims))
        self.stages_f32 = []     # unpadded f32 params (reference / "state dict")
        padded = []
        for s, (k, (fin, fout, relu)) in enumerate(zip(keys, stage_dims)):
            w, b = make_linear_params(k, fin, fout)
            self.stages_f32.append((w, b, relu))
            # Stage 0 keeps its true K extent (no input-feature padding, matching
            # the unpadded x); later stages' K equals the previous padded output.
            fin_p = fin if s == 0 else _round_up(fin, LANE)
            fout_p = _round_up(fout, LANE)
            w_p = jnp.zeros((fin_p, fout_p), jnp.bfloat16).at[:fin, :fout].set(
                w.astype(jnp.bfloat16))
            b_p = jnp.zeros((1, fout_p), jnp.float32).at[:, :fout].set(b)
            padded.append((w_p, b_p))
        self.params = tuple(padded)

    def forward(self, x, chunks_amount=1, reset_grad=False, compute_grad=True):
        assert chunks_amount == 1, (
            "This is a temporary solution to avoid problems in the backward pass")
        # TODO(synk): dist.send/recv + rank bookkeeping between pipeline ranks
        # has no Pallas equivalent in a single process; stages are fused instead.
        return pipeline_forward(
            x, self.params,
            relu_flags=self.relu_flags, out_features=self.out_features,
            single_buffer_weights=_single_buffer_weights_supported())

    def reference(self, x):
        # Same numerics as the kernel: bf16 MXU inputs, f32 accumulation/epilogue.
        h = x.astype(jnp.bfloat16)
        out = None
        for (w, b, relu) in self.stages_f32:
            acc = jnp.dot(h, w.astype(jnp.bfloat16),
                          preferred_element_type=jnp.float32) + b[None, :]
            if relu:
                acc = jnp.maximum(acc, 0.0)
            out = acc
            h = acc.astype(jnp.bfloat16)
        return out


# ------------------------------------ main ----------------------------------- #
if __name__ == "__main__":
    key = jax.random.PRNGKey(0)
    k_x, k_p = jax.random.split(key)

    batch = 256
    d_in, d_hidden, d_out = 32, 64, 16

    # 3-stage pipeline (rank_list with 3 ranks, one layer per rank):
    #   stage 0: Linear(32 -> 64) + ReLU
    #   stage 1: Linear(64 -> 64) + ReLU
    #   stage 2: Linear(64 -> 16)
    model = WeightParallelizedModelJAX(
        stage_dims=[(d_in, d_hidden, True),
                    (d_hidden, d_hidden, True),
                    (d_hidden, d_out, False)],
        key=k_p,
    )

    x = jax.random.normal(k_x, (batch, d_in), dtype=jnp.float32)

    out = model.forward(x)
    out = jax.block_until_ready(out)

    ref = model.reference(x)
    assert out.shape == (batch, d_out)
    assert jnp.allclose(out, ref, atol=1e-2, rtol=1e-2), "mismatch vs. JAX reference"

    print("KERNEL_OK")
</pallas_src>

<mosaic_0001>
module attributes {stable_mosaic.version = 11 : i64} {
  func.func @_copy_kernel(%arg0: i32, %arg1: memref<8x128xf32, #tpu.memory_space<vmem>>, %arg2: memref<8x128xf32, #tpu.memory_space<vmem>>) attributes {dimension_semantics = [#tpu.dimension_semantics<arbitrary>], iteration_bounds = array<i64: 2>, scalar_prefetch = 0 : i64, scratch_operands = 0 : i64, tpu.core_type = #tpu.core_type<tc>, window_params = [{pipeline_mode = #tpu.pipeline_mode<synchronous>, transform_indices = @transform_0, window_bounds = array<i64: 8, 128>}, {pipeline_mode = #tpu.pipeline_mode<synchronous>, transform_indices = @transform_1, window_bounds = array<i64: 8, 128>}]} {
    %c0 = arith.constant 0 : index
    %c0_0 = arith.constant 0 : index
    %0 = vector.load %arg1[%c0, %c0_0] : memref<8x128xf32, #tpu.memory_space<vmem>>, vector<8x128xf32>
    %c0_1 = arith.constant 0 : index
    %c0_2 = arith.constant 0 : index
    %1 = vector.load %arg2[%c0_1, %c0_2] : memref<8x128xf32, #tpu.memory_space<vmem>>, vector<8x128xf32>
    tpu.vector_store %arg2[%c0_1, %c0_2], %0 {strides = array<i32>} : memref<8x128xf32, #tpu.memory_space<vmem>>, vector<8x128xf32>,
    return
  }
  func.func @transform_0(%arg0: i32) -> (i32, i32) {
    %c0_i32 = arith.constant 0 : i32
    %c0_i32_0 = arith.constant 0 : i32
    %c0_i32_1 = arith.constant 0 : i32
    return %c0_i32, %c0_i32_0 : i32, i32
  }
  func.func @transform_1(%arg0: i32) -> (i32, i32) {
    %c0_i32 = arith.constant 0 : i32
    %c0_i32_0 = arith.constant 0 : i32
    %c0_i32_1 = arith.constant 0 : i32
    return %c0_i32, %c0_i32_0 : i32, i32
  }
}

module attributes {stable_mosaic.version = 11 : i64} {
  func.func @_fused_pipeline_kernel(%arg0: i32, %arg1: memref<128x32xbf16, #tpu.memory_space<vmem>>, %arg2: memref<32x128xbf16, #tpu.memory_space<vmem>>, %arg3: memref<1x128xf32, #tpu.memory_space<vmem>>, %arg4: memref<128x128xbf16, #tpu.memory_space<vmem>>, %arg5: memref<1x128xf32, #tpu.memory_space<vmem>>, %arg6: memref<128x128xbf16, #tpu.memory_space<vmem>>, %arg7: memref<1x128xf32, #tpu.memory_space<vmem>>, %arg8: memref<128x128xf32, #tpu.memory_space<vmem>>) attributes {dimension_semantics = [#tpu.dimension_semantics<parallel>], iteration_bounds = array<i64: 2>, scalar_prefetch = 0 : i64, scratch_operands = 0 : i64, tpu.core_type = #tpu.core_type<tc>, window_params = [{transform_indices = @transform_0, window_bounds = array<i64: 128, 32>}, {pipeline_mode = #tpu.pipeline_mode<synchronous>, transform_indices = @transform_1, window_bounds = array<i64: 32, 128>}, {pipeline_mode = #tpu.pipeline_mode<synchronous>, transform_indices = @transform_2, window_bounds = array<i64: 1, 128>}, {pipeline_mode = #tpu.pipeline_mode<synchronous>, transform_indices = @transform_3, window_bounds = array<i64: 128, 128>}, {pipeline_mode = #tpu.pipeline_mode<synchronous>, transform_indices = @transform_4, window_bounds = array<i64: 1, 128>}, {pipeline_mode = #tpu.pipeline_mode<synchronous>, transform_indices = @transform_5, window_bounds = array<i64: 128, 128>}, {pipeline_mode = #tpu.pipeline_mode<synchronous>, transform_indices = @transform_6, window_bounds = array<i64: 1, 128>}, {transform_indices = @transform_7, window_bounds = array<i64: 128, 128>}]} {
    %c0 = arith.constant 0 : index
    %c0_0 = arith.constant 0 : index
    %0 = vector.load %arg1[%c0, %c0_0] : memref<128x32xbf16, #tpu.memory_space<vmem>>, vector<128x32xbf16>
    %c0_1 = arith.constant 0 : index
    %c0_2 = arith.constant 0 : index
    %1 = vector.load %arg2[%c0_1, %c0_2] : memref<32x128xbf16, #tpu.memory_space<vmem>>, vector<32x128xbf16>
    %cst = arith.constant dense<0.000000e+00> : vector<128x128xf32>
    %2 = tpu.matmul %0, %1, %cst {dimension_numbers = #tpu.dot_dimension_numbers<[1], [0], [0], [1], [0, 0, 1, 1], [], []>} : vector<128x32xbf16>, vector<32x128xbf16>, vector<128x128xf32> -> vector<128x128xf32>
    %c0_3 = arith.constant 0 : index
    %c0_4 = arith.constant 0 : index
    %3 = vector.load %arg3[%c0_3, %c0_4] : memref<1x128xf32, #tpu.memory_space<vmem>>, vector<1x128xf32>
    %4 = vector.broadcast %3 : vector<1x128xf32> to vector<128x128xf32>
    %5 = arith.addf %2, %4 : vector<128x128xf32>
    %cst_5 = arith.constant 0.000000e+00 : f32
    %6 = vector.broadcast %cst_5 : f32 to vector<128x128xf32>
    %7 = arith.maximumf %5, %6 : vector<128x128xf32>
    %8 = arith.truncf %7 : vector<128x128xf32> to vector<128x128xbf16>
    %c0_6 = arith.constant 0 : index
    %c0_7 = arith.constant 0 : index
    %9 = vector.load %arg4[%c0_6, %c0_7] : memref<128x128xbf16, #tpu.memory_space<vmem>>, vector<128x128xbf16>
    %cst_8 = arith.constant dense<0.000000e+00> : vector<128x128xf32>
    %10 = tpu.matmul %8, %9, %cst_8 {dimension_numbers = #tpu.dot_dimension_numbers<[1], [0], [0], [1], [0, 0, 1, 1], [], []>} : vector<128x128xbf16>, vector<128x128xbf16>, vector<128x128xf32> -> vector<128x128xf32>
    %c0_9 = arith.constant 0 : index
    %c0_10 = arith.constant 0 : index
    %11 = vector.load %arg5[%c0_9, %c0_10] : memref<1x128xf32, #tpu.memory_space<vmem>>, vector<1x128xf32>
    %12 = vector.broadcast %11 : vector<1x128xf32> to vector<128x128xf32>
    %13 = arith.addf %10, %12 : vector<128x128xf32>
    %cst_11 = arith.constant 0.000000e+00 : f32
    %14 = vector.broadcast %cst_11 : f32 to vector<128x128xf32>
    %15 = arith.maximumf %13, %14 : vector<128x128xf32>
    %16 = arith.truncf %15 : vector<128x128xf32> to vector<128x128xbf16>
    %c0_12 = arith.constant 0 : index
    %c0_13 = arith.constant 0 : index
    %17 = vector.load %arg6[%c0_12, %c0_13] : memref<128x128xbf16, #tpu.memory_space<vmem>>, vector<128x128xbf16>
    %cst_14 = arith.constant dense<0.000000e+00> : vector<128x128xf32>
    %18 = tpu.matmul %16, %17, %cst_14 {dimension_numbers = #tpu.dot_dimension_numbers<[1], [0], [0], [1], [0, 0, 1, 1], [], []>} : vector<128x128xbf16>, vector<128x128xbf16>, vector<128x128xf32> -> vector<128x128xf32>
    %c0_15 = arith.constant 0 : index
    %c0_16 = arith.constant 0 : index
    %19 = vector.load %arg7[%c0_15, %c0_16] : memref<1x128xf32, #tpu.memory_space<vmem>>, vector<1x128xf32>
    %20 = vector.broadcast %19 : vector<1x128xf32> to vector<128x128xf32>
    %21 = arith.addf %18, %20 : vector<128x128xf32>
    %c0_17 = arith.constant 0 : index
    %c0_18 = arith.constant 0 : index
    %22 = vector.load %arg8[%c0_17, %c0_18] : memref<128x128xf32, #tpu.memory_space<vmem>>, vector<128x128xf32>
    tpu.vector_store %arg8[%c0_17, %c0_18], %21 {strides = array<i32>} : memref<128x128xf32, #tpu.memory_space<vmem>>, vector<128x128xf32>,
    return
  }
  func.func @transform_0(%arg0: i32) -> (i32, i32) {
    %c0_i32 = arith.constant 0 : i32
    %c0_i32_0 = arith.constant 0 : i32
    return %arg0, %c0_i32 : i32, i32
  }
  func.func @transform_1(%arg0: i32) -> (i32, i32) {
    %c0_i32 = arith.constant 0 : i32
    %c0_i32_0 = arith.constant 0 : i32
    %c0_i32_1 = arith.constant 0 : i32
    return %c0_i32, %c0_i32_0 : i32, i32
  }
  func.func @transform_2(%arg0: i32) -> (i32, i32) {
    %c0_i32 = arith.constant 0 : i32
    %c0_i32_0 = arith.constant 0 : i32
    %c0_i32_1 = arith.constant 0 : i32
    return %c0_i32, %c0_i32_0 : i32, i32
  }
  func.func @transform_3(%arg0: i32) -> (i32, i32) {
    %c0_i32 = arith.constant 0 : i32
    %c0_i32_0 = arith.constant 0 : i32
    %c0_i32_1 = arith.constant 0 : i32
    return %c0_i32, %c0_i32_0 : i32, i32
  }
  func.func @transform_4(%arg0: i32) -> (i32, i32) {
    %c0_i32 = arith.constant 0 : i32
    %c0_i32_0 = arith.constant 0 : i32
    %c0_i32_1 = arith.constant 0 : i32
    return %c0_i32, %c0_i32_0 : i32, i32
  }
  func.func @transform_5(%arg0: i32) -> (i32, i32) {
    %c0_i32 = arith.constant 0 : i32
    %c0_i32_0 = arith.constant 0 : i32
    %c0_i32_1 = arith.constant 0 : i32
    return %c0_i32, %c0_i32_0 : i32, i32
  }
  func.func @transform_6(%arg0: i32) -> (i32, i32) {
    %c0_i32 = arith.constant 0 : i32
    %c0_i32_0 = arith.constant 0 : i32
    %c0_i32_1 = arith.constant 0 : i32
    return %c0_i32, %c0_i32_0 : i32, i32
  }
  func.func @transform_7(%arg0: i32) -> (i32, i32) {
    %c0_i32 = arith.constant 0 : i32
    %c0_i32_0 = arith.constant 0 : i32
    return %arg0, %c0_i32 : i32, i32
  }
}

</mosaic_0001>

<bundles_post_ra>
// kernel: tpu_custom_call.1
= control target key start
LH: loop header
LB: loop body
LE: loop exit
PB: predicated region body
PF: predicated region fallthrough
CT: control target
= control target key end

     0   :  { %6 = vsyncpa [#allocation3], 0  ;;  %s304_s0 = inlined_call_operand.hbm [shape: f32[8,128], index: 0, kind: input, shape index: {}]   ;;  %s305_s1 = inlined_call_operand.hbm [shape: f32[8,128], index: 1, kind: output, shape index: {}]  }
   0x1   :  { %7 = vsyncpa [#allocation4], 0  ;;  %s257_s6 = smov 0  }
   0x2 LB: > { %s144_s7 = sadd.s32 4294967295, %s243_s6   ;;  %p145_p0 = scmp.ge.s32.totalorder %s243_s6, 1  ;;  %s243_s6 = sphi %s257_s6, %s13_s6  }
   0x3   : > { %p60_p1 = scmp.lt.s32.totalorder %s243_s6, 3  ;;  %p269_p3 = scmp.eq.s32.totalorder %s144_s7, 0 }
   0x4   : > { %s245_s10 = smov [#allocation2]  }
   0x5   : > { %p265_p2 = pnand %p145_p0, %p60_p1  ;;  %s73_s11 = sshll.u32 %s245_s10, 4  ;;  %s74_s11 = int_to_ptr.vmem [resolvable:$true] %s73_s11 }
   0x6   : > { %s190_s12 = scalar_lea.vmem %s74_s11, 128  ;;  %p198_p10 = scmp.lt.s32.totalorder %s74_s11, %s74_s11 }
   0x7   : > { %p161_p4 = pneg %p265_p2  ;;  %p191_p7 = scmp.ne.s32.totalorder %s74_s11, %s190_s12 }
   0x8   : > { %p199_p11 = scmp.lt.s32.totalorder %s190_s12, %s190_s12 }
   0x9   : > { %p162_p5 = pnand %p269_p3, %p161_p4 }
   0xa   : > { %p200_p12 = por %p199_p11, %p198_p10 }
   0xb   : > { %p181_p6 = pneg %p162_p5 }
   0xd   : > { %p193_p8 = pnand %p191_p7, %p181_p6 }
   0xf   : > { %p194_p9 = pneg %p193_p8 }
  0x11   : > { %p201_p13 = pnand %p200_p12, %p194_p9 }
  0x13   : > { %204 = shalt.err (!%p201_p13)
}
  0x14   : > { %164 = dma.hbm_to_vmem [thread:$0]  (!%p162_p5), %s304_s0, 128, %s74_s11, [#allocation3]  }
  0x15   : > { %86 = sbr.rel (%p265_p2) target bundleno = 42 (0x2a), region = 24 }
  0x1a   : > { %234 = dma.done.wait (%p269_p3), [#allocation3], 128  }
  0x1b   : > { %236 = vsyncadd (%p269_p3), [#allocation3], 4294967168  ;;  %s246_s15 = smov [#allocation5]   ;;  %p286_p0 = scmp.eq.s32.totalorder %s144_s7, 1  ;;  %v96_v0 = vld [vmem:[#allocation2] sm:$0xff] }
  0x1c   : > { %s105_s16 = sshll.u32 %s246_s15, 4  ;;  %97 = vst [vmem:[#allocation5] sm:$0xff] %v96_v0  ;;  %s106_s16 = int_to_ptr.vmem [resolvable:$true] %s105_s16 }
  0x1d   : > { %s205_s18 = scalar_lea.vmem %s106_s16, 128  ;;  %p212_p5 = scmp.lt.s32.totalorder %s106_s16, %s106_s16 }
  0x1e   : > { %p206_p1 = scmp.ne.s32.totalorder %s106_s16, %s205_s18  ;;  %p213_p6 = scmp.lt.s32.totalorder %s205_s18, %s205_s18 }
  0x20   : > { %p207_p2 = pnand %p206_p1, %p286_p0  ;;  %p214_p7 = por %p213_p6, %p212_p5 }
  0x22   : > { %p208_p4 = pneg %p207_p2 }
  0x24   : > { %p215_p8 = pnand %p214_p7, %p208_p4 }
  0x26   : > { %218 = shalt.err (!%p215_p8)
}
  0x27   : > { %158 = dma.vmem_to_hbm [thread:$0]  (%p286_p0), %s106_s16, 128, %s305_s1, [#allocation4]  }
  0x28   : > { %238 = dma.done.wait (%p286_p0), [#allocation4], 128  }
  0x29   : > { %240 = vsyncadd (%p286_p0), [#allocation4], 4294967168 }
  0x2a PF: > { %s13_s6 = sadd.s32 1, %s243_s6  }
  0x2b   : > { %p10_p3 = scmp.ge.s32.totalorder %s13_s6, 4  }
  0x2d   :  { %12 = sbr.rel (!%p10_p3) target bundleno = 2 (0x2), region = 53 }
  0x32   :  { %118 = vsyncpa [#allocation3], 1 }
  0x33   :  { %120 = vsyncpa [#allocation3 + $0x1], 1 }
  0x34   :  { %121 = vsyncpa [#allocation4], 1 }
  0x35   :  { %123 = vsyncpa [#allocation4 + $0x1], 1 }

// kernel: pipeline_forward.1
= control target key start
LH: loop header
LB: loop body
LE: loop exit
PB: predicated region body
PF: predicated region fallthrough
CT: control target
= control target key end

     0   :  { %s1196_s24 = smov 0   ;;  %s1306_s0 = inlined_call_operand.vmem [shape: bf16[256,32], index: 0, kind: input, shape index: {}]   ;;  %s1307_s1 = inlined_call_operand.vmem [shape: bf16[32,128], index: 1, kind: input, shape index: {}]   ;;  %s1308_s2 = inlined_call_operand.vmem [shape: f32[1,128], index: 2, kind: input, shape index: {}]   ;;  %s1309_s3 = inlined_call_operand.vmem [shape: bf16[128,128], index: 3, kind: input, shape index: {}]   ;;  %s1310_s4 = inlined_call_operand.vmem [shape: f32[1,128], index: 4, kind: input, shape index: {}]   ;;  %s1311_s5 = inlined_call_operand.vmem [shape: bf16[128,128], index: 5, kind: input, shape index: {}]   ;;  %s1312_s6 = inlined_call_operand.vmem [shape: f32[1,128], index: 6, kind: input, shape index: {}]   ;;  %s1313_s7 = inlined_call_operand.vmem [shape: f32[256,128], index: 7, kind: output, shape index: {}]  }
   0x1 LB: > { %s940_s25 = sadd.s32 4294967295, %s1154_s24   ;;  %p944_p0 = scmp.ge.s32.totalorder %s1154_s24, 1  ;;  %s1154_s24 = sphi %s1196_s24, %s17_s24  }
   0x2   : > { %p238_p1 = scmp.lt.s32.totalorder %s1154_s24, 3 }
   0x4   : > { %p239_p2 = pnand %p944_p0, %p238_p1 }
   0x5   : > { %s945_s28 = sshll.u32 (!%p239_p2), %s940_s25, 4 }
   0x6   : > { %242 = sbr.rel (%p239_p2) target bundleno = 658 (0x292), region = 48  ;;  %p271_p3 = scmp.lt.s32.totalorder (!%p239_p2), %s945_s28, 31 }
   0xb   : > { %v1122_v0 = vld [vmem:[%s1307_s1 + $0x8] sm:$0xff]   ;;  %v1123_v1 = vld [vmem:[%s1307_s1] sm:$0xff]   ;;  %v1132_v2 = vld [vmem:[%s1309_s3 + $0x38] sm:$0xff]   ;;  %s1315_s28 = smov (!%p271_p3, %s945_s28), 31  ;;  %vm362_vm0 = vcmask 261120  }
   0xc   : > { %1030 = vmatprep.subr.bf16.mxu0 %v1122_v0  ;;  %v1133_v3 = vld [vmem:[%s1309_s3 + $0x30] sm:$0xff]   ;;  %1050 = vmatprep.subr.bf16.mxu1 %v1132_v2  ;;  %s946_s12 = sshll.u32 %s1315_s28, 2  ;;  %v1134_v4 = vld [vmem:[%s1309_s3 + $0x28] sm:$0xff]   ;;  %v1135_v8 = vld [vmem:[%s1309_s3 + $0x20] sm:$0xff]   ;;  %s948_s29 = sshll.u32 %s1315_s28, 3 }
   0xd   : > { %1031 = vmatpush3.bf16.msra.mxu0 %v1122_v0  ;;  %1051 = vmatpush3.bf16.msra.mxu1 %v1132_v2  ;;  %s274_s15 = scalar_lea.vmem %s1306_s0, %s946_s12  ;;  %v1136_v9 = vld [vmem:[%s1309_s3 + $0x18] sm:$0xff]   ;;  %v1137_v15 = vld [vmem:[%s1309_s3 + $0x10] sm:$0xff]   ;;  %v1138_v16 = vld [vmem:[%s1309_s3 + $0x8] sm:$0xff]   ;;  %s1285_s11 = scalar_lea.vmem %s1313_s7, %s948_s29 }
   0xe   : > { %1032 = vmatprep.subr.bf16.mxu0 %v1123_v1  ;;  %1052 = vmatprep.subr.bf16.mxu1 %v1133_v3  ;;  %v1124_v5 = vld [vmem:[%s274_s15] sm:$0xff]   ;;  %v1125_v6 = vld [vmem:[%s274_s15 + $0x8] sm:$0xff]   ;;  %v1126_v7 = vld [vmem:[%s274_s15 + $0x10] sm:$0xff]  }
   0xf   : > { %1034 = vmatprep.mubr.msk.bf16.mxu0 %vm362_vm0, %v1124_v5  ;;  %v1127_v10 = vld [vmem:[%s274_s15 + $0x18] sm:$0xff]   ;;  %v1128_v11 = vld [vmem:[%s274_s15 + $0x20] sm:$0xff]   ;;  %v1129_v12 = vld [vmem:[%s274_s15 + $0x28] sm:$0xff]  }
  0x10   : > { %v1130_v13 = vld [vmem:[%s274_s15 + $0x30] sm:$0xff]   ;;  %v1131_v14 = vld [vmem:[%s274_s15 + $0x38] sm:$0xff]   ;;  %v1139_v17 = vld [vmem:[%s1309_s3] sm:$0xff]  }
  0x11   : > { %1033 = vmatpush3.bf16.msra.mxu0 %v1123_v1  ;;  %1053 = vmatpush3.bf16.msra.mxu1 %v1133_v3  ;;  %v1140_v18 = vld [vmem:[%s1311_s5 + $0x38] sm:$0xff]   ;;  %v1141_v19 = vld [vmem:[%s1311_s5 + $0x30] sm:$0xff]   ;;  %v1142_v20 = vld [vmem:[%s1311_s5 + $0x28] sm:$0xff]  }
  0x12   : > { %1054 = vmatprep.subr.bf16.mxu1 %v1134_v4  ;;  %1082 = vmatprep.subr.bf16.mxu0 %v1140_v18  ;;  %v1143_v21 = vld [vmem:[%s1311_s5 + $0x20] sm:$0xff]   ;;  %v1144_v22 = vld [vmem:[%s1311_s5 + $0x18] sm:$0xff]  }
  0x13   : > { %v949_v25 = vld [vmem:[%s1308_s2] ss:$0 sm:$0xff] }
  0x14   : > { %1035 = vmatmul.mubr.msk.bf16.vlgmr.msra.gmra.mxu0 %vm362_vm0, %v1125_v6 }
  0x15   : > { %1038 = vmatprep.mubr.msk.bf16.mxu0 %vm362_vm0, %v1126_v7  ;;  %1055 = vmatpush3.bf16.msra.mxu1 %v1134_v4 }
  0x16   : > { %1056 = vmatprep.subr.bf16.mxu1 %v1135_v8  ;;  %1083 = vmatpush3.bf16.msra.mxu0 %v1140_v18  ;;  %v1147_v18 = vld [vmem:[%s1311_s5] sm:$0xff]  }
  0x17   : > { %1084 = vmatprep.subr.bf16.mxu0 %v1141_v19 }
  0x19   : > { %1057 = vmatpush3.bf16.msra.mxu1 %v1135_v8 }
  0x1a   : > { %1058 = vmatprep.subr.bf16.mxu1 %v1136_v9  ;;  %1085 = vmatpush3.bf16.msra.mxu0 %v1141_v19 }
  0x1b   : > { %1086 = vmatprep.subr.bf16.mxu0 %v1142_v20 }
  0x1c   : > { %1039 = vmatmul.mubr.msk.bf16.gmra.mxu0 %vm362_vm0, %v1127_v10 }
  0x1d   : > { %1042 = vmatprep.mubr.msk.bf16.mxu0 %vm362_vm0, %v1128_v11  ;;  %1059 = vmatpush3.bf16.msra.mxu1 %v1136_v9 }
  0x1e   : > { %1060 = vmatprep.subr.bf16.mxu1 %v1137_v15  ;;  %1087 = vmatpush3.bf16.msra.mxu0 %v1142_v20 }
  0x1f   : > { %1088 = vmatprep.subr.bf16.mxu0 %v1143_v21 }
  0x21   : > { %1061 = vmatpush3.bf16.msra.mxu1 %v1137_v15 }
  0x22   : > { %1062 = vmatprep.subr.bf16.mxu1 %v1138_v16  ;;  %1089 = vmatpush3.bf16.msra.mxu0 %v1143_v21  ;;  %v968_v21 = vld [vmem:[%s1310_s4] ss:$0 sm:$0xff] }
  0x23   : > { %1090 = vmatprep.subr.bf16.mxu0 %v1144_v22 }
  0x24   : > { %1043 = vmatmul.mubr.msk.bf16.gmra.mxu0 %vm362_vm0, %v1129_v12 }
  0x25   : > { %1046 = vmatprep.mubr.msk.bf16.mxu0 %vm362_vm0, %v1130_v13  ;;  %1063 = vmatpush3.bf16.msra.mxu1 %v1138_v16  ;;  %v1145_v16 = vld [vmem:[%s1311_s5 + $0x10] sm:$0xff]  }
  0x26   : > { %1064 = vmatprep.subr.bf16.mxu1 %v1139_v17  ;;  %1091 = vmatpush3.bf16.msra.mxu0 %v1144_v22 }
  0x27   : > { %1092 = vmatprep.subr.bf16.mxu0 %v1145_v16 }
  0x29   : > { %1065 = vmatpush3.bf16.msra.mxu1 %v1139_v17  ;;  %v1146_v17 = vld [vmem:[%s1311_s5 + $0x8] sm:$0xff]  }
  0x2a   : > { %1093 = vmatpush3.bf16.msra.mxu0 %v1145_v16 }
  0x2b   : > { %1094 = vmatprep.subr.bf16.mxu0 %v1146_v17 }
  0x2c   : > { %1047 = vmatmul.mubr.msk.bf16.gmra.mxu0 %vm362_vm0, %v1131_v14 }
  0x2e   : > { %1095 = vmatpush3.bf16.msra.mxu0 %v1146_v17 }
  0x2f   : > { %1096 = vmatprep.subr.bf16.mxu0 %v1147_v18 }
  0x32   : > { %1097 = vmatpush3.bf16.msra.mxu0 %v1147_v18 }
  0xd4   : > { %v1036_v23 = vpop.f32.mrf.mxu0 }
  0xd5   : > { %v430_v29 = vadd.f32 %v1036_v23, %v949_v25 }
  0xd6   : > { %v421_v24 = vpop.f32.mrf.mxu0 }
  0xd7   : > { %v422_v27 = vadd.f32 %v949_v25, %v421_v24  ;;  %v486_v36 = vmax.f32 %v430_v29, 0.0 }
  0xd8   : > { %v1037_v26 = vpop.f32.mrf.mxu0 }
  0xd9   : > { %v433_v28 = vadd.f32 %v1037_v26, %v949_v25  ;;  %v484_v34 = vmax.f32 %v422_v27, 0.0 }
  0xda   : > { %v424_v30 = vpop.f32.mrf.mxu0 }
  0xdb   : > { %v425_v31 = vadd.f32 %v949_v25, %v424_v30  ;;  %v487_v32 = vmax.f32 %v433_v28, 0.0 }
  0xdc   : > { %v1040_v33 = vpop.f32.mrf.mxu0 }
  0xdd   : > { %v485_v35 = vmax.f32 %v425_v31, 0.0  ;;  %v501_v39 = vpack.c.bf16 %v487_v32, %v486_v36  ;;  %v446_v43 = vadd.f32 %v1040_v33, %v949_v25 }
  0xde   : > { %v437_v37 = vpop.f32.mrf.mxu0 }
  0xdf   : > { %v500_v38 = vpack.c.bf16 %v485_v35, %v484_v34  ;;  %v438_v41 = vadd.f32 %v949_v25, %v437_v37  ;;  %v490_v50 = vmax.f32 %v446_v43, 0.0 }
  0xe0   : > { %v1041_v40 = vpop.f32.mrf.mxu0 }
  0xe1   : > { %v449_v42 = vadd.f32 %v1041_v40, %v949_v25  ;;  %1066 = vmatprep.mubr.bf16.mxu1 %v500_v38  ;;  %v488_v48 = vmax.f32 %v438_v41, 0.0 }
  0xe2   : > { %v440_v44 = vpop.f32.mrf.mxu0  ;;  %1067 = vmatmul.mubr.bf16.vlgmr.msra.gmra.mxu1 %v501_v39 }
  0xe3   : > { %v441_v45 = vadd.f32 %v949_v25, %v440_v44  ;;  %v491_v46 = vmax.f32 %v449_v42, 0.0 }
  0xe4   : > { %v1044_v47 = vpop.f32.mrf.mxu0 }
  0xe5   : > { %v489_v49 = vmax.f32 %v441_v45, 0.0  ;;  %v503_v53 = vpack.c.bf16 %v491_v46, %v490_v50  ;;  %v462_v57 = vadd.f32 %v1044_v47, %v949_v25 }
  0xe6   : > { %v453_v51 = vpop.f32.mrf.mxu0 }
  0xe7   : > { %v502_v52 = vpack.c.bf16 %v489_v49, %v488_v48  ;;  %v454_v55 = vadd.f32 %v949_v25, %v453_v51  ;;  %v494_v0 = vmax.f32 %v462_v57, 0.0 }
  0xe8   : > { %v1045_v54 = vpop.f32.mrf.mxu0 }
  0xe9   : > { %v465_v56 = vadd.f32 %v1045_v54, %v949_v25  ;;  %1070 = vmatprep.mubr.bf16.mxu1 %v502_v52  ;;  %v492_v62 = vmax.f32 %v454_v55, 0.0 }
  0xea   : > { %v456_v58 = vpop.f32.mrf.mxu0  ;;  %1071 = vmatmul.mubr.bf16.gmra.mxu1 %v503_v53 }
  0xeb   : > { %v457_v59 = vadd.f32 %v949_v25, %v456_v58  ;;  %v495_v60 = vmax.f32 %v465_v56, 0.0 }
  0xec   : > { %v1048_v61 = vpop.f32.mrf.mxu0 }
  0xed   : > { %v493_v63 = vmax.f32 %v457_v59, 0.0  ;;  %v505_v3 = vpack.c.bf16 %v495_v60, %v494_v0  ;;  %v478_v7 = vadd.f32 %v1048_v61, %v949_v25 }
  0xee   : > { %v469_v1 = vpop.f32.mrf.mxu0 }
  0xef   : > { %v504_v2 = vpack.c.bf16 %v493_v63, %v492_v62  ;;  %v470_v5 = vadd.f32 %v949_v25, %v469_v1  ;;  %v498_v13 = vmax.f32 %v478_v7, 0.0 }
  0xf0   : > { %v1049_v4 = vpop.f32.mrf.mxu0 }
  0xf1   : > { %v481_v6 = vadd.f32 %v1049_v4, %v949_v25  ;;  %1074 = vmatprep.mubr.bf16.mxu1 %v504_v2  ;;  %v496_v11 = vmax.f32 %v470_v5, 0.0 }
  0xf2   : > { %v472_v8 = vpop.f32.mrf.mxu0  ;;  %1075 = vmatmul.mubr.bf16.gmra.mxu1 %v505_v3 }
  0xf3   : > { %v473_v9 = vadd.f32 %v949_v25, %v472_v8  ;;  %v499_v10 = vmax.f32 %v481_v6, 0.0 }
  0xf5   : > { %v497_v12 = vmax.f32 %v473_v9, 0.0  ;;  %v507_v15 = vpack.c.bf16 %v499_v10, %v498_v13 }
  0xf7   : > { %v506_v14 = vpack.c.bf16 %v497_v12, %v496_v11  ;;  %v977_v12 = vld [vmem:[%s1312_s6] ss:$0 sm:$0xff] }
  0xf9   : > { %1078 = vmatprep.mubr.bf16.mxu1 %v506_v14 }
  0xfa   : > { %1079 = vmatmul.mubr.bf16.gmra.mxu1 %v507_v15 }
 0x1a2   : > { %v1068_v19 = vpop.f32.mrf.mxu1 }
 0x1a3   : > { %v622_v25 = vadd.f32 %v1068_v19, %v968_v21 }
 0x1a4   : > { %v613_v20 = vpop.f32.mrf.mxu1 }
 0x1a5   : > { %v614_v23 = vadd.f32 %v968_v21, %v613_v20  ;;  %v678_v32 = vmax.f32 %v622_v25, 0.0 }
 0x1a6   : > { %v1069_v22 = vpop.f32.mrf.mxu1 }
 0x1a7   : > { %v625_v24 = vadd.f32 %v1069_v22, %v968_v21  ;;  %v676_v30 = vmax.f32 %v614_v23, 0.0 }
 0x1a8   : > { %v616_v26 = vpop.f32.mrf.mxu1 }
 0x1a9   : > { %v617_v27 = vadd.f32 %v968_v21, %v616_v26  ;;  %v679_v28 = vmax.f32 %v625_v24, 0.0 }
 0x1aa   : > { %v1072_v29 = vpop.f32.mrf.mxu1 }
 0x1ab   : > { %v677_v31 = vmax.f32 %v617_v27, 0.0  ;;  %v693_v35 = vpack.c.bf16 %v679_v28, %v678_v32  ;;  %v638_v39 = vadd.f32 %v1072_v29, %v968_v21 }
 0x1ac   : > { %v629_v33 = vpop.f32.mrf.mxu1 }
 0x1ad   : > { %v692_v34 = vpack.c.bf16 %v677_v31, %v676_v30  ;;  %v630_v37 = vadd.f32 %v968_v21, %v629_v33  ;;  %v682_v46 = vmax.f32 %v638_v39, 0.0 }
 0x1ae   : > { %v1073_v36 = vpop.f32.mrf.mxu1 }
 0x1af   : > { %v641_v38 = vadd.f32 %v1073_v36, %v968_v21  ;;  %1098 = vmatprep.mubr.bf16.mxu0 %v692_v34  ;;  %v680_v44 = vmax.f32 %v630_v37, 0.0 }
 0x1b0   : > { %v632_v40 = vpop.f32.mrf.mxu1  ;;  %1099 = vmatmul.mubr.bf16.vlgmr.msra.gmra.mxu0 %v693_v35 }
 0x1b1   : > { %v633_v41 = vadd.f32 %v968_v21, %v632_v40  ;;  %v683_v42 = vmax.f32 %v641_v38, 0.0 }
 0x1b2   : > { %v1076_v43 = vpop.f32.mrf.mxu1 }
 0x1b3   : > { %v681_v45 = vmax.f32 %v633_v41, 0.0  ;;  %v695_v49 = vpack.c.bf16 %v683_v42, %v682_v46  ;;  %v654_v53 = vadd.f32 %v1076_v43, %v968_v21 }
 0x1b4   : > { %v645_v47 = vpop.f32.mrf.mxu1 }
 0x1b5   : > { %v694_v48 = vpack.c.bf16 %v681_v45, %v680_v44  ;;  %v646_v51 = vadd.f32 %v968_v21, %v645_v47  ;;  %v686_v60 = vmax.f32 %v654_v53, 0.0 }
 0x1b6   : > { %v1077_v50 = vpop.f32.mrf.mxu1 }
 0x1b7   : > { %v657_v52 = vadd.f32 %v1077_v50, %v968_v21  ;;  %1102 = vmatprep.mubr.bf16.mxu0 %v694_v48  ;;  %v684_v58 = vmax.f32 %v646_v51, 0.0 }
 0x1b8   : > { %v648_v54 = vpop.f32.mrf.mxu1  ;;  %1103 = vmatmul.mubr.bf16.gmra.mxu0 %v695_v49 }
 0x1b9   : > { %v649_v55 = vadd.f32 %v968_v21, %v648_v54  ;;  %v687_v56 = vmax.f32 %v657_v52, 0.0 }
 0x1ba   : > { %v1080_v57 = vpop.f32.mrf.mxu1 }
 0x1bb   : > { %v685_v59 = vmax.f32 %v649_v55, 0.0  ;;  %v697_v63 = vpack.c.bf16 %v687_v56, %v686_v60  ;;  %v670_v3 = vadd.f32 %v1080_v57, %v968_v21 }
 0x1bc   : > { %v661_v61 = vpop.f32.mrf.mxu1 }
 0x1bd   : > { %v696_v62 = vpack.c.bf16 %v685_v59, %v684_v58  ;;  %v662_v1 = vadd.f32 %v968_v21, %v661_v61  ;;  %v690_v9 = vmax.f32 %v670_v3, 0.0 }
 0x1be   : > { %v1081_v0 = vpop.f32.mrf.mxu1 }
 0x1bf   : > { %v673_v2 = vadd.f32 %v1081_v0, %v968_v21  ;;  %1106 = vmatprep.mubr.bf16.mxu0 %v696_v62  ;;  %v688_v7 = vmax.f32 %v662_v1, 0.0 }
 0x1c0   : > { %v664_v4 = vpop.f32.mrf.mxu1  ;;  %1107 = vmatmul.mubr.bf16.gmra.mxu0 %v697_v63 }
 0x1c1   : > { %v665_v5 = vadd.f32 %v968_v21, %v664_v4  ;;  %v691_v6 = vmax.f32 %v673_v2, 0.0 }
 0x1c3   : > { %v689_v8 = vmax.f32 %v665_v5, 0.0  ;;  %v699_v11 = vpack.c.bf16 %v691_v6, %v690_v9 }
 0x1c5   : > { %v698_v10 = vpack.c.bf16 %v689_v8, %v688_v7 }
 0x1c7   : > { %1110 = vmatprep.mubr.bf16.mxu0 %v698_v10 }
 0x1c8   : > { %1111 = vmatmul.mubr.bf16.gmra.mxu0 %v699_v11 }
 0x270   : > { %v1100_v13 = vpop.f32.mrf.mxu0 }
 0x271   : > { %v814_v14 = vadd.f32 %v1100_v13, %v977_v12 }
 0x272   : > { %v805_v15 = vpop.f32.mrf.mxu0 }
 0x273   : > { %870 = vst [vmem:[%s1285_s11 + $0x10] sm:$0xff] %v814_v14  ;;  %v806_v16 = vadd.f32 %v977_v12, %v805_v15 }
 0x274   : > { %v1101_v17 = vpop.f32.mrf.mxu0 }
 0x275   : > { %868 = vst [vmem:[%s1285_s11] sm:$0xff] %v806_v16  ;;  %v817_v18 = vadd.f32 %v1101_v17, %v977_v12 }
 0x276   : > { %v808_v19 = vpop.f32.mrf.mxu0 }
 0x277   : > { %871 = vst [vmem:[%s1285_s11 + $0x18] sm:$0xff] %v817_v18  ;;  %v809_v20 = vadd.f32 %v977_v12, %v808_v19 }
 0x278   : > { %v1104_v21 = vpop.f32.mrf.mxu0 }
 0x279   : > { %869 = vst [vmem:[%s1285_s11 + $0x8] sm:$0xff] %v809_v20  ;;  %v830_v22 = vadd.f32 %v1104_v21, %v977_v12 }
 0x27a   : > { %v821_v23 = vpop.f32.mrf.mxu0 }
 0x27b   : > { %874 = vst [vmem:[%s1285_s11 + $0x30] sm:$0xff] %v830_v22  ;;  %v822_v24 = vadd.f32 %v977_v12, %v821_v23 }
 0x27c   : > { %v1105_v25 = vpop.f32.mrf.mxu0 }
 0x27d   : > { %872 = vst [vmem:[%s1285_s11 + $0x20] sm:$0xff] %v822_v24  ;;  %v833_v26 = vadd.f32 %v1105_v25, %v977_v12 }
 0x27e   : > { %v824_v27 = vpop.f32.mrf.mxu0 }
 0x27f   : > { %875 = vst [vmem:[%s1285_s11 + $0x38] sm:$0xff] %v833_v26  ;;  %v825_v28 = vadd.f32 %v977_v12, %v824_v27 }
 0x280   : > { %v1108_v29 = vpop.f32.mrf.mxu0 }
 0x281   : > { %873 = vst [vmem:[%s1285_s11 + $0x28] sm:$0xff] %v825_v28  ;;  %v846_v30 = vadd.f32 %v1108_v29, %v977_v12 }
 0x282   : > { %v837_v31 = vpop.f32.mrf.mxu0 }
 0x283   : > { %878 = vst [vmem:[%s1285_s11 + $0x50] sm:$0xff] %v846_v30  ;;  %v838_v32 = vadd.f32 %v977_v12, %v837_v31 }
 0x284   : > { %v1109_v33 = vpop.f32.mrf.mxu0 }
 0x285   : > { %876 = vst [vmem:[%s1285_s11 + $0x40] sm:$0xff] %v838_v32  ;;  %v849_v34 = vadd.f32 %v1109_v33, %v977_v12 }
 0x286   : > { %v840_v35 = vpop.f32.mrf.mxu0 }
 0x287   : > { %879 = vst [vmem:[%s1285_s11 + $0x58] sm:$0xff] %v849_v34  ;;  %v841_v36 = vadd.f32 %v977_v12, %v840_v35 }
 0x288   : > { %v1112_v37 = vpop.f32.mrf.mxu0 }
 0x289   : > { %877 = vst [vmem:[%s1285_s11 + $0x48] sm:$0xff] %v841_v36  ;;  %v862_v38 = vadd.f32 %v1112_v37, %v977_v12 }
 0x28a   : > { %v853_v39 = vpop.f32.mrf.mxu0 }
 0x28b   : > { %882 = vst [vmem:[%s1285_s11 + $0x70] sm:$0xff] %v862_v38  ;;  %v854_v40 = vadd.f32 %v977_v12, %v853_v39 }
 0x28c   : > { %v1113_v41 = vpop.f32.mrf.mxu0 }
 0x28d   : > { %880 = vst [vmem:[%s1285_s11 + $0x60] sm:$0xff] %v854_v40  ;;  %v865_v42 = vadd.f32 %v1113_v41, %v977_v12 }
 0x28e   : > { %v856_v43 = vpop.f32.mrf.mxu0 }
 0x28f   : > { %883 = vst [vmem:[%s1285_s11 + $0x78] sm:$0xff] %v865_v42  ;;  %v857_v44 = vadd.f32 %v977_v12, %v856_v43 }
 0x291   : > { %881 = vst [vmem:[%s1285_s11 + $0x68] sm:$0xff] %v857_v44 }
 0x292 PF: > { %s17_s24 = sadd.s32 1, %s1154_s24  }
 0x293   : > { %p14_p4 = scmp.ge.s32.totalorder %s17_s24, 4  }
 0x295   :  { %16 = sbr.rel (!%p14_p4) target bundleno = 1 (0x1), region = 78 }

</bundles_post_ra>
